<compile_context>
chip_gen: v7x
topology: tpu7x:2x2x1
jax: 0.10.0
libtpu: 0.0.40
codegen_flags: <defaults>
</compile_context>

<pallas_src>
import jax
import jax.numpy as jnp
from jax.experimental import pallas as pl
from jax.experimental.pallas import tpu as pltpu

BN_EPS = 1e-5
CP = 128      # conv1 channel count (100) zero-padded to a full lane width


# ----------------------------- kernels --------------------------------------

def _stats_kernel(patches_ref, w1_ref, stats_ref):
    """Pass 1: per-channel sum / sum-of-squares of z = patches @ w1 (no bias)."""
    @pl.when(pl.program_id(1) == 0)
    def _():
        stats_ref[...] = jnp.zeros_like(stats_ref)

    z = jnp.dot(patches_ref[...], w1_ref[...],
                preferred_element_type=jnp.float32)
    # Zero-padded patch rows give z == 0 exactly (no bias added here), so they
    # contribute nothing to either statistic -> no row masking needed.
    stats_ref[...] += jnp.concatenate(
        [jnp.sum(z, axis=0, keepdims=True),
         jnp.sum(z * z, axis=0, keepdims=True)], axis=0)


def _apply_kernel(patches_ref, w1_ref, b1_ref, w2_ref, b2_ref, out_ref):
    """Pass 2: conv1 with BN folded into (w1, b1) + ReLU + conv2 + sigmoid."""
    h = jnp.dot(patches_ref[...], w1_ref[...],
                preferred_element_type=jnp.float32) + b1_ref[...]
    h = jnp.maximum(h, 0.0)                       # ReLU (BN already folded)

    # conv2 (100->1, 1x1): one whole-tile transpose, one VPU multiply, one
    # sublane reduce, one sigmoid, one lane-dense (1, tm) store.
    h_t = jnp.transpose(h)                                      # (CP, tm)
    row = jnp.sum(h_t * w2_ref[...], axis=0, keepdims=True)     # (1, tm)
    out_ref[...] = jax.nn.sigmoid(row + b2_ref[...])


# ----------------------------- wrapper ---------------------------------------

def _pick_tile(m, k1):
    """Largest 128-multiple tile that fits a ~24 MiB VMEM budget and (when
    possible) yields >= 2 tiles so both v7x TensorCores get work."""
    budget = 24 << 20

    def fits(tm):
        # double-buffered bf16 patches + f32 h + f32 h^T + resident weights
        return 2 * tm * k1 * 2 + 2 * tm * CP * 4 + k1 * CP * 2 <= budget

    for tm in (1024, 512, 256, 128):
        if fits(tm) and (m + tm - 1) // tm >= 2:
            return tm
    return 128


def im2col_3x3_same(x_nchw):
    """Extract 3x3 'same' patches. Returns (B*H*W, C_in*9), rows in B,H,W order."""
    B, C, H, W = x_nchw.shape
    xp = jnp.pad(x_nchw, ((0, 0), (0, 0), (1, 1), (1, 1)))
    cols = [xp[:, :, kh:kh + H, kw:kw + W] for kh in range(3) for kw in range(3)]
    patches = jnp.stack(cols, axis=2)                     # (B, C, 9, H, W)
    patches = patches.transpose(0, 3, 4, 1, 2)            # (B, H, W, C, 9)
    return patches.reshape(B * H * W, C * 9)


def mask_predictor_forward(x_nchw, params):
    """x_nchw: (B, C_in, H, W) float32. Returns (B, 1, H, W) float32."""
    B, C, H, W = x_nchw.shape
    M = B * H * W
    K1 = C * 9
    tm = _pick_tile(M, K1)

    n_tiles = (M + tm - 1) // tm
    ncores = 2 if n_tiles >= 2 else 1                 # megacore split of pass 1
    n_tiles = ((n_tiles + ncores - 1) // ncores) * ncores
    tiles_per_core = n_tiles // ncores
    m_pad = n_tiles * tm

    # im2col materialized directly in bf16 (halves wrapper-side slab traffic).
    patches = im2col_3x3_same(x_nchw.astype(jnp.bfloat16))
    if m_pad != M:
        patches = jnp.pad(patches, ((0, m_pad - M), (0, 0)))

    # Zero-pad the 100-channel dim to 128 lanes (all-zero padded params =>
    # padded channels stay exactly 0 everywhere -> no NaNs, no bias).
    w1_f32 = jnp.zeros((K1, CP), jnp.float32).at[:, :100].set(params["w1"])
    gamma = jnp.zeros((1, CP), jnp.float32).at[:, :100].set(params["gamma"])
    beta = jnp.zeros((1, CP), jnp.float32).at[:, :100].set(params["beta"])
    w2 = jnp.zeros((CP, 1), jnp.float32).at[:100, :].set(params["w2"])
    b2 = params["b2"].reshape(1, 1).astype(jnp.float32)
    w1_bf16 = w1_f32.astype(jnp.bfloat16)

    # ---- pass 1: streaming per-channel sum / sum-of-squares of z -------------
    stats = pl.pallas_call(
        _stats_kernel,
        grid=(ncores, tiles_per_core),
        in_specs=[
            pl.BlockSpec((tm, K1),
                         lambda c, i, tpc=tiles_per_core: (c * tpc + i, 0)),
            pl.BlockSpec((K1, CP), lambda c, i: (0, 0)),
        ],
        out_specs=pl.BlockSpec((None, 2, CP), lambda c, i: (c, 0, 0)),
        out_shape=jax.ShapeDtypeStruct((ncores, 2, CP), jnp.float32),
        compiler_params=pltpu.CompilerParams(
            dimension_semantics=("parallel", "arbitrary")),
        cost_estimate=pl.CostEstimate(
            flops=2 * m_pad * K1 * CP + 3 * m_pad * CP,
            transcendentals=0,
            bytes_accessed=m_pad * K1 * 2 + K1 * CP * 2 + ncores * 2 * CP * 4),
    )(patches, w1_bf16)

    # Finalize BatchNorm (training-mode batch stats, biased variance) and fold
    # mean/var/gamma/beta into the conv1 weights/bias (f32 fold, then bf16).
    # Note: the conv1 bias cancels exactly against the batch mean, so it never
    # appears in the folded parameters.
    # TODO(synk): shifted / Kahan accumulation for very large M to avoid
    #             E[x^2]-mean^2 cancellation.
    s = jnp.sum(stats, axis=0)                        # sum core partials: (2, CP)
    mean_z = s[0] / M
    var = jnp.maximum(s[1] / M - mean_z * mean_z, 0.0)
    inv_std = jax.lax.rsqrt(var + BN_EPS)
    scale = gamma[0] * inv_std                                   # (CP,)
    w1_fold = (w1_f32 * scale[None, :]).astype(jnp.bfloat16)     # (K1, CP)
    b1_fold = (beta[0] - mean_z * scale).reshape(1, CP)          # (1, CP) f32

    # ---- pass 2: folded conv1 + ReLU + conv2 + sigmoid, lane-dense output ----
    out = pl.pallas_call(
        _apply_kernel,
        grid=(n_tiles,),
        in_specs=[
            pl.BlockSpec((tm, K1), lambda i: (i, 0)),
            pl.BlockSpec((K1, CP), lambda i: (0, 0)),
            pl.BlockSpec((1, CP), lambda i: (0, 0)),
            pl.BlockSpec((CP, 1), lambda i: (0, 0)),
            pl.BlockSpec((1, 1), lambda i: (0, 0)),
        ],
        out_specs=pl.BlockSpec((None, 1, tm), lambda i: (i, 0, 0)),
        out_shape=jax.ShapeDtypeStruct((n_tiles, 1, tm), jnp.float32),
        compiler_params=pltpu.CompilerParams(
            dimension_semantics=("parallel",)),
        cost_estimate=pl.CostEstimate(
            flops=2 * m_pad * K1 * CP + 4 * m_pad * CP,
            transcendentals=m_pad,
            bytes_accessed=m_pad * K1 * 2 + K1 * CP * 2 + m_pad * 4),
    )(patches, w1_fold, b1_fold, w2, b2)

    mask = out.reshape(m_pad)[:M].reshape(B, H, W)
    return mask[:, None, :, :]                         # NCHW (B, 1, H, W)


# ----------------------------- reference & params ----------------------------

def mask_predictor_reference(x_nchw, params):
    """Pure-JAX f32 reference of the same forward pass."""
    B, C, H, W = x_nchw.shape
    patches = im2col_3x3_same(x_nchw.astype(jnp.float32))
    h = patches @ params["w1"] + params["b1"]
    mean = jnp.mean(h, axis=0, keepdims=True)
    var = jnp.mean((h - mean) ** 2, axis=0, keepdims=True)
    h = (h - mean) * jax.lax.rsqrt(var + BN_EPS) * params["gamma"] + params["beta"]
    h = jnp.maximum(h, 0.0)
    o = jax.nn.sigmoid(h @ params["w2"] + params["b2"])
    return o.reshape(B, H, W, 1).transpose(0, 3, 1, 2)


def init_params(key, c_in):
    k1, k2, k3, k4, k5, k6 = jax.random.split(key, 6)
    # conv1 weight in PyTorch layout (100, C_in, 3, 3), reshaped to matmul form.
    w1_t = jax.random.normal(k1, (100, c_in, 3, 3), jnp.float32) * 0.1
    w1 = w1_t.reshape(100, c_in * 9).T                         # (C_in*9, 100)
    b1 = jax.random.normal(k2, (1, 100), jnp.float32) * 0.1
    gamma = 1.0 + 0.1 * jax.random.normal(k3, (1, 100), jnp.float32)
    beta = 0.1 * jax.random.normal(k4, (1, 100), jnp.float32)
    # conv2 weight PyTorch layout (1, 100, 1, 1) -> (100, 1)
    w2 = (jax.random.normal(k5, (1, 100, 1, 1), jnp.float32) * 0.1).reshape(1, 100).T
    b2 = jax.random.normal(k6, (1, 1), jnp.float32) * 0.1
    return {"w1": w1, "b1": b1, "gamma": gamma, "beta": beta, "w2": w2, "b2": b2}


if __name__ == "__main__":
    key = jax.random.PRNGKey(0)
    k_x, k_p = jax.random.split(key)

    B, C_in, H, W = 2, 4, 16, 16
    x = jax.random.normal(k_x, (B, C_in, H, W), jnp.float32)
    params = init_params(k_p, C_in)

    fwd = jax.jit(mask_predictor_forward)
    out = fwd(x, params)
    jax.block_until_ready(out)

    assert out.shape == (B, 1, H, W), out.shape
    assert bool(jnp.all(jnp.isfinite(out)))
    assert bool(jnp.all((out >= 0.0) & (out <= 1.0)))   # sigmoid range

    ref = mask_predictor_reference(x, params)
    max_err = float(jnp.max(jnp.abs(out - ref)))
    assert max_err < 5e-2, f"max abs err vs reference: {max_err}"

    print("KERNEL_OK")
</pallas_src>

<mosaic_0001>
module attributes {stable_mosaic.version = 11 : i64} {
  func.func @_stats_kernel(%arg0: i32, %arg1: i32, %arg2: memref<256x36xbf16, #tpu.memory_space<vmem>>, %arg3: memref<36x128xbf16, #tpu.memory_space<vmem>>, %arg4: memref<1x2x128xf32, #tpu.memory_space<vmem>>) attributes {dimension_semantics = [#tpu.dimension_semantics<parallel>, #tpu.dimension_semantics<arbitrary>], iteration_bounds = array<i64: 2, 1>, scalar_prefetch = 0 : i64, scratch_operands = 0 : i64, tpu.core_type = #tpu.core_type<tc>, window_params = [{transform_indices = @transform_0, window_bounds = array<i64: 256, 36>}, {pipeline_mode = #tpu.pipeline_mode<synchronous>, transform_indices = @transform_1, window_bounds = array<i64: 36, 128>}, {transform_indices = @transform_2, window_bounds = array<i64: 1, 2, 128>}]} {
    %c0_i32 = arith.constant 0 : i32
    %0 = arith.cmpi eq, %arg1, %c0_i32 : i32
    %1 = arith.extui %0 : i1 to i32
    %c0_i32_0 = arith.constant 0 : i32
    %2 = arith.cmpi ne, %1, %c0_i32_0 : i32
    scf.if %2 {
      %cst_12 = arith.constant 0.000000e+00 : f32
      %18 = vector.broadcast %cst_12 : f32 to vector<2x128xf32>
      %c0_13 = arith.constant 0 : index
      %c0_14 = arith.constant 0 : index
      %c0_15 = arith.constant 0 : index
      %19 = vector.load %arg4[%c0_13, %c0_14, %c0_15] : memref<1x2x128xf32, #tpu.memory_space<vmem>>, vector<1x2x128xf32>
      %20 = vector.shape_cast %19 : vector<1x2x128xf32> to vector<2x128xf32>
      %21 = vector.shape_cast %18 : vector<2x128xf32> to vector<1x2x128xf32>
      tpu.vector_store %arg4[%c0_13, %c0_14, %c0_15], %21 {strides = array<i32>} : memref<1x2x128xf32, #tpu.memory_space<vmem>>, vector<1x2x128xf32>,
    } else {
    }
    %c0 = arith.constant 0 : index
    %c0_1 = arith.constant 0 : index
    %3 = vector.load %arg2[%c0, %c0_1] : memref<256x36xbf16, #tpu.memory_space<vmem>>, vector<256x36xbf16>
    %c0_2 = arith.constant 0 : index
    %c0_3 = arith.constant 0 : index
    %4 = vector.load %arg3[%c0_2, %c0_3] : memref<36x128xbf16, #tpu.memory_space<vmem>>, vector<36x128xbf16>
    %cst = arith.constant dense<0.000000e+00> : vector<256x128xf32>
    %5 = tpu.matmul %3, %4, %cst {dimension_numbers = #tpu.dot_dimension_numbers<[1], [0], [0], [1], [0, 0, 1, 1], [], []>} : vector<256x36xbf16>, vector<36x128xbf16>, vector<256x128xf32> -> vector<256x128xf32>
    %c0_4 = arith.constant 0 : index
    %c0_5 = arith.constant 0 : index
    %c0_6 = arith.constant 0 : index
    %6 = vector.load %arg4[%c0_4, %c0_5, %c0_6] : memref<1x2x128xf32, #tpu.memory_space<vmem>>, vector<1x2x128xf32>
    %7 = vector.shape_cast %6 : vector<1x2x128xf32> to vector<2x128xf32>
    %cst_7 = arith.constant dense<0.000000e+00> : vector<128xf32>
    %8 = vector.multi_reduction <add>, %5, %cst_7 [0] : vector<256x128xf32> to vector<128xf32>
    %9 = vector.shape_cast %8 : vector<128xf32> to vector<1x128xf32>
    %10 = arith.mulf %5, %5 : vector<256x128xf32>
    %cst_8 = arith.constant dense<0.000000e+00> : vector<128xf32>
    %11 = vector.multi_reduction <add>, %10, %cst_8 [0] : vector<256x128xf32> to vector<128xf32>
    %12 = vector.shape_cast %11 : vector<128xf32> to vector<1x128xf32>
    %13 = tpu.concatenate %9, %12 in 0 : vector<1x128xf32>, vector<1x128xf32> -> vector<2x128xf32>
    %14 = arith.addf %7, %13 : vector<2x128xf32>
    %c0_9 = arith.constant 0 : index
    %c0_10 = arith.constant 0 : index
    %c0_11 = arith.constant 0 : index
    %15 = vector.load %arg4[%c0_9, %c0_10, %c0_11] : memref<1x2x128xf32, #tpu.memory_space<vmem>>, vector<1x2x128xf32>
    %16 = vector.shape_cast %15 : vector<1x2x128xf32> to vector<2x128xf32>
    %17 = vector.shape_cast %14 : vector<2x128xf32> to vector<1x2x128xf32>
    tpu.vector_store %arg4[%c0_9, %c0_10, %c0_11], %17 {strides = array<i32>} : memref<1x2x128xf32, #tpu.memory_space<vmem>>, vector<1x2x128xf32>,
    return
  }
  func.func @transform_0(%arg0: i32, %arg1: i32) -> (i32, i32) {
    %c1_i32 = arith.constant 1 : i32
    %0 = arith.muli %arg0, %c1_i32 : i32
    %1 = arith.addi %0, %arg1 : i32
    %c0_i32 = arith.constant 0 : i32
    %c0_i32_0 = arith.constant 0 : i32
    return %1, %c0_i32 : i32, i32
  }
  func.func @transform_1(%arg0: i32, %arg1: i32) -> (i32, i32) {
    %c0_i32 = arith.constant 0 : i32
    %c0_i32_0 = arith.constant 0 : i32
    %c0_i32_1 = arith.constant 0 : i32
    return %c0_i32, %c0_i32_0 : i32, i32
  }
  func.func @transform_2(%arg0: i32, %arg1: i32) -> (i32, i32, i32) {
    %c0_i32 = arith.constant 0 : i32
    %c0_i32_0 = arith.constant 0 : i32
    %c0_i32_1 = arith.constant 0 : i32
    return %arg0, %c0_i32, %c0_i32_0 : i32, i32, i32
  }
}

module attributes {stable_mosaic.version = 11 : i64} {
  func.func @_apply_kernel(%arg0: i32, %arg1: memref<256x36xbf16, #tpu.memory_space<vmem>>, %arg2: memref<36x128xbf16, #tpu.memory_space<vmem>>, %arg3: memref<1x128xf32, #tpu.memory_space<vmem>>, %arg4: memref<128x1xf32, #tpu.memory_space<vmem>>, %arg5: memref<1x1xf32, #tpu.memory_space<vmem>>, %arg6: memref<1x1x256xf32, #tpu.memory_space<vmem>>) attributes {dimension_semantics = [#tpu.dimension_semantics<parallel>], iteration_bounds = array<i64: 2>, scalar_prefetch = 0 : i64, scratch_operands = 0 : i64, tpu.core_type = #tpu.core_type<tc>, window_params = [{transform_indices = @transform_0, window_bounds = array<i64: 256, 36>}, {pipeline_mode = #tpu.pipeline_mode<synchronous>, transform_indices = @transform_1, window_bounds = array<i64: 36, 128>}, {pipeline_mode = #tpu.pipeline_mode<synchronous>, transform_indices = @transform_2, window_bounds = array<i64: 1, 128>}, {pipeline_mode = #tpu.pipeline_mode<synchronous>, transform_indices = @transform_3, window_bounds = array<i64: 128, 1>}, {pipeline_mode = #tpu.pipeline_mode<synchronous>, transform_indices = @transform_4, window_bounds = array<i64: 1, 1>}, {transform_indices = @transform_5, window_bounds = array<i64: 1, 1, 256>}]} {
    %c0 = arith.constant 0 : index
    %c0_0 = arith.constant 0 : index
    %0 = vector.load %arg1[%c0, %c0_0] : memref<256x36xbf16, #tpu.memory_space<vmem>>, vector<256x36xbf16>
    %c0_1 = arith.constant 0 : index
    %c0_2 = arith.constant 0 : index
    %1 = vector.load %arg2[%c0_1, %c0_2] : memref<36x128xbf16, #tpu.memory_space<vmem>>, vector<36x128xbf16>
    %cst = arith.constant dense<0.000000e+00> : vector<256x128xf32>
    %2 = tpu.matmul %0, %1, %cst {dimension_numbers = #tpu.dot_dimension_numbers<[1], [0], [0], [1], [0, 0, 1, 1], [], []>} : vector<256x36xbf16>, vector<36x128xbf16>, vector<256x128xf32> -> vector<256x128xf32>
    %c0_3 = arith.constant 0 : index
    %c0_4 = arith.constant 0 : index
    %3 = vector.load %arg3[%c0_3, %c0_4] : memref<1x128xf32, #tpu.memory_space<vmem>>, vector<1x128xf32>
    %4 = vector.broadcast %3 : vector<1x128xf32> to vector<256x128xf32>
    %5 = arith.addf %2, %4 : vector<256x128xf32>
    %cst_5 = arith.constant 0.000000e+00 : f32
    %6 = vector.broadcast %cst_5 : f32 to vector<256x128xf32>
    %7 = arith.maximumf %5, %6 : vector<256x128xf32>
    %8 = tpu.transpose %7, [1, 0] : vector<256x128xf32> -> vector<128x256xf32>
    %c0_6 = arith.constant 0 : index
    %c0_7 = arith.constant 0 : index
    %9 = vector.load %arg4[%c0_6, %c0_7] : memref<128x1xf32, #tpu.memory_space<vmem>>, vector<128x1xf32>
    %10 = vector.broadcast %9 : vector<128x1xf32> to vector<128x256xf32>
    %11 = arith.mulf %8, %10 : vector<128x256xf32>
    %cst_8 = arith.constant dense<0.000000e+00> : vector<256xf32>
    %12 = vector.multi_reduction <add>, %11, %cst_8 [0] : vector<128x256xf32> to vector<256xf32>
    %13 = vector.shape_cast %12 : vector<256xf32> to vector<1x256xf32>
    %c0_9 = arith.constant 0 : index
    %c0_10 = arith.constant 0 : index
    %14 = vector.load %arg5[%c0_9, %c0_10] : memref<1x1xf32, #tpu.memory_space<vmem>>, vector<1x1xf32>
    %15 = vector.broadcast %14 : vector<1x1xf32> to vector<1x256xf32>
    %16 = arith.addf %13, %15 : vector<1x256xf32>
    %17 = arith.negf %16 : vector<1x256xf32>
    %18 = math.exp %17 : vector<1x256xf32>
    %cst_11 = arith.constant 1.000000e+00 : f32
    %19 = vector.broadcast %cst_11 : f32 to vector<1x256xf32>
    %20 = arith.addf %19, %18 : vector<1x256xf32>
    %21 = arith.divf %19, %20 : vector<1x256xf32>
    %c0_12 = arith.constant 0 : index
    %c0_13 = arith.constant 0 : index
    %c0_14 = arith.constant 0 : index
    %22 = vector.load %arg6[%c0_12, %c0_13, %c0_14] : memref<1x1x256xf32, #tpu.memory_space<vmem>>, vector<1x1x256xf32>
    %23 = vector.shape_cast %22 : vector<1x1x256xf32> to vector<1x256xf32>
    %24 = vector.shape_cast %21 : vector<1x256xf32> to vector<1x1x256xf32>
    tpu.vector_store %arg6[%c0_12, %c0_13, %c0_14], %24 {strides = array<i32>} : memref<1x1x256xf32, #tpu.memory_space<vmem>>, vector<1x1x256xf32>,
    return
  }
  func.func @transform_0(%arg0: i32) -> (i32, i32) {
    %c0_i32 = arith.constant 0 : i32
    %c0_i32_0 = arith.constant 0 : i32
    return %arg0, %c0_i32 : i32, i32
  }
  func.func @transform_1(%arg0: i32) -> (i32, i32) {
    %c0_i32 = arith.constant 0 : i32
    %c0_i32_0 = arith.constant 0 : i32
    %c0_i32_1 = arith.constant 0 : i32
    return %c0_i32, %c0_i32_0 : i32, i32
  }
  func.func @transform_2(%arg0: i32) -> (i32, i32) {
    %c0_i32 = arith.constant 0 : i32
    %c0_i32_0 = arith.constant 0 : i32
    %c0_i32_1 = arith.constant 0 : i32
    return %c0_i32, %c0_i32_0 : i32, i32
  }
  func.func @transform_3(%arg0: i32) -> (i32, i32) {
    %c0_i32 = arith.constant 0 : i32
    %c0_i32_0 = arith.constant 0 : i32
    %c0_i32_1 = arith.constant 0 : i32
    return %c0_i32, %c0_i32_0 : i32, i32
  }
  func.func @transform_4(%arg0: i32) -> (i32, i32) {
    %c0_i32 = arith.constant 0 : i32
    %c0_i32_0 = arith.constant 0 : i32
    %c0_i32_1 = arith.constant 0 : i32
    return %c0_i32, %c0_i32_0 : i32, i32
  }
  func.func @transform_5(%arg0: i32) -> (i32, i32, i32) {
    %c0_i32 = arith.constant 0 : i32
    %c0_i32_0 = arith.constant 0 : i32
    %c0_i32_1 = arith.constant 0 : i32
    return %arg0, %c0_i32, %c0_i32_0 : i32, i32, i32
  }
}

</mosaic_0001>

<bundles_post_ra>
// kernel: mask_predictor_forward.2
= control target key start
LH: loop header
LB: loop body
LE: loop exit
PB: predicated region body
PF: predicated region fallthrough
CT: control target
= control target key end

     0   :  { %s881_s9 = smov 0   ;;  %s883_s10 = smov 0   ;;  %s997_s0 = inlined_call_operand.vmem [shape: bf16[512,36], index: 0, kind: input, shape index: {}]   ;;  %s998_s1 = inlined_call_operand.vmem [shape: bf16[36,128], index: 1, kind: input, shape index: {}]   ;;  %s999_s2 = inlined_call_operand.vmem [shape: f32[2,2,128], index: 2, kind: output, shape index: {}]  }
   0x1   :  { %s885_s11 = smov 0  }
   0x2 LB: > { %s24_s12 = sadd.s32 1, %s859_s10  ;;  %p691_p0 = scmp.ge.s32.totalorder %s863_s11, 1  ;;  %s863_s11 = sphi %s885_s11, %s12_s11   ;;  %s859_s10 = sphi %s883_s10, %s1001_s10   ;;  %s855_s9 = sphi %s881_s9, %s1000_s9  }
   0x3   : > { %p26_p1 = scmp.ge.s32.totalorder %s24_s12, 2  ;;  %p129_p2 = scmp.lt.s32.totalorder %s863_s11, 3 }
   0x5   : > { %s1003_s12 = smov (%p26_p1, %s24_s12), 0  ;;  %p130_p3 = pnand %p691_p0, %p129_p2 }
   0x6   : > { %v822_v0 = vld [vmem:[%s998_s1] sm:$0xff] (!%p130_p3)   ;;  %v823_v1 = vld [vmem:[%s998_s1 + $0x8] sm:$0xff] (!%p130_p3)   ;;  %s692_s17 = sshll.u32 (!%p130_p3), %s855_s9, 5  ;;  %v824_v2 = vld [vmem:[%s998_s1 + $0x10] ss:$0 sps:$4 sm:$0x33] (!%p130_p3)  }
   0x7   : > { %133 = sbr.rel (%p130_p3) target bundleno = 314 (0x13a), region = 28  ;;  %751 = vmatprep.subr.bf16.mxu0 (!%p130_p3), %v822_v0  ;;  %p153_p4 = scmp.lt.s32.totalorder (!%p130_p3), %s692_s17, 63  ;;  %789 = vmatprep.subr.bf16.mxu1 (!%p130_p3), %v822_v0  ;;  %vm350_vm0 = vcmask (!%p130_p3), 1041408   ;;  %vm301_vm1 = vcmask (!%p130_p3), 293888   ;;  %v865_v20 = vmov (!%p130_p3), 0.0   ;;  %vm622_vm2 = vcmask (!%p130_p3), 1040384  }
   0x8   : > { %752 = vmatpush3.bf16.msra.mxu0 (!%p130_p3), %v822_v0  ;;  %792 = vmatpush3.bf16.msra.mxu1 (!%p130_p3), %v822_v0  ;;  %v352_v3 = vsel (!%p130_p3), %vm350_vm0, %v824_v2, 0  ;;  %p159_p5 = scmp.lt.s32.totalorder (!%p130_p3), %s855_s9, 1 }
   0x9   : > { %753 = vmatprep.subr.bf16.mxu0 (!%p130_p3), %v823_v1  ;;  %790 = vmatprep.subr.bf16.mxu1 (!%p130_p3), %v823_v1 }
   0xc   : > { %754 = vmatpush3.bf16.msra.mxu0 (!%p130_p3), %v823_v1  ;;  %793 = vmatpush3.bf16.msra.mxu1 (!%p130_p3), %v823_v1 }
   0xd   : > { %795 = vmatprep.subr.msk.bf16.mxu0 (!%p130_p3), %vm350_vm0, %v824_v2  ;;  %796 = vmatprep.subr.msk.bf16.mxu1 (!%p130_p3), %vm350_vm0, %v824_v2 }
   0xe   : > { %s1005_s17 = smov (!%p153_p4, %s692_s17), 63  ;;  %s1007_s9 = smov (!%p159_p5, %s855_s9), 1 }
   0xf   : > { %s693_s20 = sshll.u32 %s1005_s17, 2  ;;  %s694_s24 = sshll.u32 %s1007_s9, 1 }
  0x10   : > { %s914_s23 = scalar_lea.vmem %s997_s0, %s693_s20  ;;  %756 = vmatpush3.bf16.msra.mxu0 %v352_v3  ;;  %794 = vmatpush3.bf16.msra.mxu1 %v352_v3  ;;  %s953_s27 = scalar_lea.vmem %s999_s2, %s694_s24 }
  0x11   : > { %v825_v4 = vld [vmem:[%s914_s23] sm:$0xff]   ;;  %v826_v5 = vld [vmem:[%s914_s23 + $0x8] sm:$0xff]   ;;  %v827_v6 = vld [vmem:[%s914_s23 + $0x10] sm:$0xff]   ;;  %168 = vst [vmem:[%s953_s27] sm:$0x3] %v865_v20 }
  0x12   : > { %757 = vmatprep.mubr.msk.bf16.mxu0 %vm301_vm1, %v825_v4  ;;  %v828_v7 = vld [vmem:[%s914_s23 + $0x18] sm:$0xff]   ;;  %v833_v8 = vld [vmem:[%s914_s23 + $0x40] sm:$0xff]   ;;  %v834_v9 = vld [vmem:[%s914_s23 + $0x48] sm:$0xff]  }
  0x13   : > { %758 = vmatmul.mubr.msk.bf16.vlgmr.msra.gmra.mrb[0].mxu0 %vm301_vm1, %v826_v5  ;;  %773 = vmatprep.mubr.msk.bf16.mxu1 %vm301_vm1, %v833_v8  ;;  %v835_v10 = vld [vmem:[%s914_s23 + $0x50] sm:$0xff]   ;;  %v829_v11 = vld [vmem:[%s914_s23 + $0x20] sm:$0xff]   ;;  %v836_v12 = vld [vmem:[%s914_s23 + $0x58] sm:$0xff]  }
  0x14   : > { %761 = vmatprep.mubr.msk.bf16.mxu0 %vm301_vm1, %v827_v6  ;;  %774 = vmatmul.mubr.msk.bf16.vlgmr.msra.gmra.mrb[0].mxu1 %vm301_vm1, %v834_v9  ;;  %v837_v13 = vld [vmem:[%s914_s23 + $0x60] sm:$0xff]   ;;  %v830_v14 = vld [vmem:[%s914_s23 + $0x28] sm:$0xff]   ;;  %v831_v15 = vld [vmem:[%s914_s23 + $0x30] sm:$0xff]  }
  0x15   : > { %777 = vmatprep.mubr.msk.bf16.mxu1 %vm301_vm1, %v835_v10  ;;  %v838_v16 = vld [vmem:[%s914_s23 + $0x68] sm:$0xff]   ;;  %v839_v17 = vld [vmem:[%s914_s23 + $0x70] sm:$0xff]   ;;  %v832_v18 = vld [vmem:[%s914_s23 + $0x38] sm:$0xff]  }
  0x16   : > { %v840_v19 = vld [vmem:[%s914_s23 + $0x78] sm:$0xff]  }
  0x1b   : > { %762 = vmatmul.mubr.msk.bf16.gmra.mrb[4].mxu0 %vm301_vm1, %v828_v7 }
  0x1c   : > { %765 = vmatprep.mubr.msk.bf16.mxu0 %vm301_vm1, %v829_v11  ;;  %778 = vmatmul.mubr.msk.bf16.gmra.mrb[4].mxu1 %vm301_vm1, %v836_v12 }
  0x1d   : > { %781 = vmatprep.mubr.msk.bf16.mxu1 %vm301_vm1, %v837_v13 }
  0x23   : > { %766 = vmatmul.mubr.msk.bf16.gmra.mrb[8].mxu0 %vm301_vm1, %v830_v14 }
  0x24   : > { %769 = vmatprep.mubr.msk.bf16.mxu0 %vm301_vm1, %v831_v15  ;;  %782 = vmatmul.mubr.msk.bf16.gmra.mrb[8].mxu1 %vm301_vm1, %v838_v16 }
  0x25   : > { %785 = vmatprep.mubr.msk.bf16.mxu1 %vm301_vm1, %v839_v17 }
  0x2b   : > { %770 = vmatmul.mubr.msk.bf16.gmra.mrb[12].mxu0 %vm301_vm1, %v832_v18 }
  0x2c   : > { %786 = vmatmul.mubr.msk.bf16.gmra.mrb[12].mxu1 %vm301_vm1, %v840_v19 }
  0xe6   : > { %v759_v21 = vpop.f32.mrb[0].mxu0 }
  0xe7   : > { %v388_v22 = vpop.f32.mrb[1].mxu0  ;;  %v956_v28 = vpop.f32.mrb[0].mxu1  ;;  %v555_v29 = vmul.f32 %v759_v21, %v759_v21 }
  0xe8   : > { %v760_v23 = vpop.f32.mrb[2].mxu0  ;;  %v553_v25 = vmul.f32 %v388_v22, %v388_v22  ;;  %v958_v32 = vpop.f32.mrb[1].mxu1 }
  0xe9   : > { %v391_v24 = vpop.f32.mrb[3].mxu0  ;;  %v960_v33 = vpop.f32.mrb[2].mxu1  ;;  %v556_v34 = vmul.f32 %v760_v23, %v760_v23 }
  0xea   : > { %v516_v26 = vadd.f32 %v391_v24, %v388_v22  ;;  %v554_v27 = vmul.f32 %v391_v24, %v391_v24  ;;  %v962_v38 = vpop.f32.mrb[3].mxu1 }
  0xec   : > { %v517_v30 = vadd.f32 %v759_v21, %v516_v26  ;;  %v585_v31 = vadd.f32 %v554_v27, %v553_v25 }
  0xee   : > { %v586_v35 = vadd.f32 %v585_v31, %v555_v29  ;;  %v763_v36 = vpop.f32.mrb[4].mxu0  ;;  %v518_v37 = vadd.f32 %v760_v23, %v517_v30 }
  0xef   : > { %v404_v39 = vpop.f32.mrb[5].mxu0  ;;  %v964_v48 = vpop.f32.mrb[4].mxu1  ;;  %v559_v49 = vmul.f32 %v763_v36, %v763_v36 }
  0xf0   : > { %v519_v40 = vadd.f32 %v518_v37, %v404_v39  ;;  %v557_v41 = vmul.f32 %v404_v39, %v404_v39  ;;  %v587_v42 = vadd.f32 %v586_v35, %v556_v34  ;;  %v764_v43 = vpop.f32.mrb[6].mxu0  ;;  %v468_v52 = vpop.f32.mrb[5].mxu1 }
  0xf1   : > { %v407_v44 = vpop.f32.mrb[7].mxu0  ;;  %v966_v53 = vpop.f32.mrb[6].mxu1  ;;  %v560_v54 = vmul.f32 %v764_v43, %v764_v43 }
  0xf2   : > { %v588_v45 = vadd.f32 %v587_v42, %v557_v41  ;;  %v520_v46 = vadd.f32 %v519_v40, %v407_v44  ;;  %v558_v47 = vmul.f32 %v407_v44, %v407_v44  ;;  %v471_v58 = vpop.f32.mrb[7].mxu1  ;;  %v571_v44 = vmul.f32 %v956_v28, %v956_v28 }
  0xf4   : > { %v521_v50 = vadd.f32 %v763_v36, %v520_v46  ;;  %v589_v51 = vadd.f32 %v588_v45, %v558_v47  ;;  %v569_v36 = vmul.f32 %v958_v32, %v958_v32  ;;  %v572_v47 = vmul.f32 %v960_v33, %v960_v33 }
  0xf6   : > { %v590_v55 = vadd.f32 %v589_v51, %v559_v49  ;;  %v767_v56 = vpop.f32.mrb[8].mxu0  ;;  %v522_v57 = vadd.f32 %v764_v43, %v521_v50  ;;  %v570_v43 = vmul.f32 %v962_v38, %v962_v38 }
  0xf7   : > { %v420_v59 = vpop.f32.mrb[9].mxu0  ;;  %v783_v4 = vpop.f32.mrb[8].mxu1  ;;  %v563_v5 = vmul.f32 %v767_v56, %v767_v56 }
  0xf8   : > { %v523_v60 = vadd.f32 %v522_v57, %v420_v59  ;;  %v561_v61 = vmul.f32 %v420_v59, %v420_v59  ;;  %v591_v62 = vadd.f32 %v590_v55, %v560_v54  ;;  %v768_v63 = vpop.f32.mrb[10].mxu0  ;;  %v484_v8 = vpop.f32.mrb[9].mxu1  ;;  %v574_v57 = vmul.f32 %v471_v58, %v471_v58 }
  0xf9   : > { %v423_v0 = vpop.f32.mrb[11].mxu0  ;;  %v784_v9 = vpop.f32.mrb[10].mxu1  ;;  %v564_v10 = vmul.f32 %v768_v63, %v768_v63 }
  0xfa   : > { %v592_v1 = vadd.f32 %v591_v62, %v561_v61  ;;  %v524_v2 = vadd.f32 %v523_v60, %v423_v0  ;;  %v562_v3 = vmul.f32 %v423_v0, %v423_v0  ;;  %v487_v14 = vpop.f32.mrb[11].mxu1 }
  0xfc   : > { %v525_v6 = vadd.f32 %v767_v56, %v524_v2  ;;  %v593_v7 = vadd.f32 %v592_v1, %v562_v3  ;;  %v578_v2 = vmul.f32 %v487_v14, %v487_v14  ;;  %v579_v3 = vmul.f32 %v783_v4, %v783_v4 }
  0xfe   : > { %v594_v11 = vadd.f32 %v593_v7, %v563_v5  ;;  %v771_v12 = vpop.f32.mrb[12].mxu0  ;;  %v526_v13 = vadd.f32 %v768_v63, %v525_v6  ;;  %v577_v63 = vmul.f32 %v484_v8, %v484_v8  ;;  %v580_v6 = vmul.f32 %v784_v9, %v784_v9 }
  0xff   : > { %v436_v15 = vpop.f32.mrb[13].mxu0  ;;  %v787_v24 = vpop.f32.mrb[12].mxu1  ;;  %v567_v25 = vmul.f32 %v771_v12, %v771_v12 }
 0x100   : > { %v527_v16 = vadd.f32 %v526_v13, %v436_v15  ;;  %v565_v17 = vmul.f32 %v436_v15, %v436_v15  ;;  %v595_v18 = vadd.f32 %v594_v11, %v564_v10  ;;  %v772_v19 = vpop.f32.mrb[14].mxu0  ;;  %v500_v29 = vpop.f32.mrb[13].mxu1 }
 0x101   : > { %v439_v20 = vpop.f32.mrb[15].mxu0  ;;  %v788_v30 = vpop.f32.mrb[14].mxu1  ;;  %v568_v31 = vmul.f32 %v772_v19, %v772_v19 }
 0x102   : > { %v596_v21 = vadd.f32 %v595_v18, %v565_v17  ;;  %v528_v22 = vadd.f32 %v527_v16, %v439_v20  ;;  %v566_v23 = vmul.f32 %v439_v20, %v439_v20  ;;  %v503_v37 = vpop.f32.mrb[15].mxu1  ;;  %v583_v17 = vmul.f32 %v787_v24, %v787_v24 }
 0x103   : > { %v582_v16 = vmul.f32 %v503_v37, %v503_v37 }
 0x104   : > { %v529_v26 = vadd.f32 %v771_v12, %v528_v22  ;;  %v597_v27 = vadd.f32 %v596_v21, %v566_v23 }
 0x106   : > { %v598_v34 = vadd.f32 %v597_v27, %v567_v25  ;;  %v530_v35 = vadd.f32 %v772_v19, %v529_v26 }
 0x108   : > { %v531_v39 = vadd.f32 %v530_v35, %v958_v32  ;;  %v599_v40 = vadd.f32 %v598_v34, %v568_v31  ;;  %v573_v32 = vmul.f32 %v468_v52, %v468_v52  ;;  %v515_v34 = vld [vmem:[%s953_s27] sm:$0x3] }
 0x10a   : > { %v600_v41 = vadd.f32 %v599_v40, %v569_v36  ;;  %v532_v42 = vadd.f32 %v531_v39, %v962_v38  ;;  %v575_v38 = vmul.f32 %v964_v48, %v964_v48 }
 0x10c   : > { %v533_v45 = vadd.f32 %v956_v28, %v532_v42  ;;  %v601_v46 = vadd.f32 %v600_v41, %v570_v43  ;;  %v576_v28 = vmul.f32 %v966_v53, %v966_v53 }
 0x10e   : > { %v602_v49 = vadd.f32 %v601_v46, %v571_v44  ;;  %v534_v50 = vadd.f32 %v960_v33, %v533_v45 }
 0x110   : > { %v535_v51 = vadd.f32 %v534_v50, %v468_v52  ;;  %v603_v54 = vadd.f32 %v602_v49, %v572_v47 }
 0x112   : > { %v604_v55 = vadd.f32 %v603_v54, %v573_v32  ;;  %v536_v56 = vadd.f32 %v535_v51, %v471_v58 }
 0x114   : > { %v537_v59 = vadd.f32 %v964_v48, %v536_v56  ;;  %v605_v60 = vadd.f32 %v604_v55, %v574_v57  ;;  %v581_v48 = vmul.f32 %v500_v29, %v500_v29 }
 0x116   : > { %v606_v61 = vadd.f32 %v605_v60, %v575_v38  ;;  %v538_v62 = vadd.f32 %v966_v53, %v537_v59 }
 0x118   : > { %v539_v33 = vadd.f32 %v538_v62, %v484_v8  ;;  %v607_v0 = vadd.f32 %v606_v61, %v576_v28  ;;  %v584_v8 = vmul.f32 %v788_v30, %v788_v30 }
 0x11a   : > { %v608_v52 = vadd.f32 %v607_v0, %v577_v63  ;;  %v540_v1 = vadd.f32 %v539_v33, %v487_v14 }
 0x11c   : > { %v541_v58 = vadd.f32 %v783_v4, %v540_v1  ;;  %v609_v5 = vadd.f32 %v608_v52, %v578_v2 }
 0x11e   : > { %v610_v7 = vadd.f32 %v609_v5, %v579_v3  ;;  %v542_v10 = vadd.f32 %v784_v9, %v541_v58 }
 0x120   : > { %v543_v11 = vadd.f32 %v542_v10, %v500_v29  ;;  %v611_v12 = vadd.f32 %v610_v7, %v580_v6 }
 0x122   : > { %v612_v13 = vadd.f32 %v611_v12, %v581_v48  ;;  %v544_v15 = vadd.f32 %v543_v11, %v503_v37 }
 0x124   : > { %v545_v53 = vadd.f32 %v787_v24, %v544_v15  ;;  %v613_v18 = vadd.f32 %v612_v13, %v582_v16 }
 0x126   : > { %v546_v19 = vadd.f32 %v788_v30, %v545_v53  ;;  %v614_v20 = vadd.f32 %v613_v18, %v583_v17 }
 0x128   : > { %v547_v14 = vrot.slane %v546_v19, 4  ;;  %v615_v21 = vadd.f32 %v614_v20, %v584_v8 }
 0x12a   : > { %v548_v4 = vadd.f32 %v547_v14, %v546_v19  ;;  %v616_v22 = vrot.slane %v615_v21, 4 }
 0x12c   : > { %v549_v23 = vrot.slane %v548_v4, 2  ;;  %v617_v9 = vadd.f32 %v616_v22, %v615_v21 }
 0x12e   : > { %v550_v25 = vadd.f32 %v549_v23, %v548_v4  ;;  %v618_v26 = vrot.slane %v617_v9, 2 }
 0x130   : > { %v551_v27 = vrot.slane %v550_v25, 1  ;;  %v619_v29 = vadd.f32 %v618_v26, %v617_v9 }
 0x132   : > { %v620_v31 = vrot.slane %v619_v29, 1  ;;  %v552_v24 = vadd.f32 %v551_v27, %v550_v25 }
 0x134   : > { %v621_v35 = vadd.f32 %v620_v31, %v619_v29 }
 0x136   : > { %v623_v36 = vsel %vm622_vm2, %v552_v24, %v621_v35 }
 0x137   : > { %v624_v37 = vadd.f32 %v623_v36, %v515_v34 }
 0x139   : > { %625 = vst [vmem:[%s953_s27] sm:$0x3] %v624_v37 }
 0x13a PF: > { %s12_s11 = sadd.s32 1, %s863_s11   ;;  %s1000_s9 = smov %s859_s10 }
 0x13b   : > { %p9_p6 = scmp.ge.s32.totalorder %s12_s11, 4   ;;  %s1001_s10 = smov %s1003_s12 }
 0x13d   :  { %11 = sbr.rel (!%p9_p6) target bundleno = 2 (0x2), region = 62 }

// kernel: mask_predictor_forward.3
= control target key start
LH: loop header
LB: loop body
LE: loop exit
PB: predicated region body
PF: predicated region fallthrough
CT: control target
= control target key end

     0   :  { %s1142_s20 = smov 0   ;;  %s1326_s0 = inlined_call_operand.vmem [shape: bf16[512,36], index: 0, kind: input, shape index: {}]   ;;  %s1327_s1 = inlined_call_operand.vmem [shape: bf16[36,128], index: 1, kind: input, shape index: {}]   ;;  %s1328_s2 = inlined_call_operand.vmem [shape: f32[1,128], index: 2, kind: input, shape index: {}]   ;;  %s1329_s3 = inlined_call_operand.vmem [shape: f32[128,1], index: 3, kind: input, shape index: {}]   ;;  %s1330_s4 = inlined_call_operand.<no memory space> [shape: f32[1,1], index: 4, kind: input, shape index: {}]   ;;  %s1331_s5 = inlined_call_operand.vmem [shape: f32[2,1,256], index: 5, kind: output, shape index: {}]  }
   0x1   :  { %v10_v0 = vstv %s1330_s4 }
   0x2   :  { %11 = vst [vmem:[#allocation2] sm:$0x1] %v10_v0 }
   0x3 LB: > { %s1148_s21 = sadd.s32 4294967295, %s1105_s20   ;;  %p951_p0 = scmp.ge.s32.totalorder %s1105_s20, 1  ;;  %s1105_s20 = sphi %s1142_s20, %s17_s20  }
   0x4   : > { %p190_p1 = scmp.lt.s32.totalorder %s1105_s20, 3 }
   0x6   : > { %p191_p2 = pnand %p951_p0, %p190_p1 }
   0x7   : > { %v1072_v1 = vld [vmem:[%s1327_s1] sm:$0xff] (!%p191_p2)   ;;  %v1073_v2 = vld [vmem:[%s1327_s1 + $0x8] sm:$0xff] (!%p191_p2)   ;;  %s952_s25 = sshll.u32 (!%p191_p2), %s1148_s21, 5  ;;  %v1074_v4 = vld [vmem:[%s1327_s1 + $0x10] ss:$0 sps:$4 sm:$0x33] (!%p191_p2)  }
   0x8   : > { %194 = sbr.rel (%p191_p2) target bundleno = 519 (0x207), region = 40  ;;  %1014 = vmatprep.subr.bf16.mxu0 (!%p191_p2), %v1072_v1  ;;  %1052 = vmatprep.subr.bf16.mxu1 (!%p191_p2), %v1072_v1  ;;  %p218_p3 = scmp.lt.s32.totalorder (!%p191_p2), %s952_s25, 63  ;;  %v677_v3 = vld [vmem:[%s1329_s3] sm:$0xff] (!%p191_p2)  ;;  %vm416_vm0 = vcmask (!%p191_p2), 1041408   ;;  %v1107_v5 = vmov (!%p191_p2), 0   ;;  %vm367_vm1 = vcmask (!%p191_p2), 293888  }
   0x9   : > { %1015 = vmatpush3.bf16.msra.mxu0 (!%p191_p2), %v1072_v1  ;;  %1055 = vmatpush3.bf16.msra.mxu1 (!%p191_p2), %v1072_v1  ;;  %v678_v6 = vld [vmem:[%s1329_s3 + $0x8] sm:$0xff] (!%p191_p2)  ;;  %v418_v7 = vsel (!%p191_p2), %vm416_vm0, %v1074_v4, 0  ;;  %v679_v11 = vld [vmem:[%s1329_s3 + $0x10] sm:$0xff] (!%p191_p2)  ;;  %v680_v15 = vld [vmem:[%s1329_s3 + $0x18] sm:$0xff] (!%p191_p2)  ;;  %p223_p4 = scmp.lt.s32.totalorder (!%p191_p2), %s1148_s21, 1 }
   0xa   : > { %1016 = vmatprep.subr.bf16.mxu0 (!%p191_p2), %v1073_v2  ;;  %1053 = vmatprep.subr.bf16.mxu1 (!%p191_p2), %v1073_v2  ;;  %v681_v20 = vld [vmem:[%s1329_s3 + $0x20] sm:$0xff] (!%p191_p2)  ;;  %v682_v21 = vld [vmem:[%s1329_s3 + $0x28] sm:$0xff] (!%p191_p2)  ;;  %v683_v26 = vld [vmem:[%s1329_s3 + $0x30] sm:$0xff] (!%p191_p2) }
   0xb   : > { %1070 = vset.pattern.permute.xlu1 (!%p191_p2), %v1107_v5  ;;  %v684_v27 = vld [vmem:[%s1329_s3 + $0x38] sm:$0xff] (!%p191_p2)  ;;  %v685_v30 = vld [vmem:[%s1329_s3 + $0x40] sm:$0xff] (!%p191_p2)  ;;  %v686_v31 = vld [vmem:[%s1329_s3 + $0x48] sm:$0xff] (!%p191_p2) }
   0xc   : > { %695 = vperm.xlu1 (!%p191_p2), %1070, %v677_v3   ;;  %v687_v32 = vld [vmem:[%s1329_s3 + $0x50] sm:$0xff] (!%p191_p2)  ;;  %v688_v33 = vld [vmem:[%s1329_s3 + $0x58] sm:$0xff] (!%p191_p2)  ;;  %v689_v34 = vld [vmem:[%s1329_s3 + $0x60] sm:$0xff] (!%p191_p2) }
   0xd   : > { %1017 = vmatpush3.bf16.msra.mxu0 (!%p191_p2), %v1073_v2  ;;  %1056 = vmatpush3.bf16.msra.mxu1 (!%p191_p2), %v1073_v2  ;;  %v690_v35 = vld [vmem:[%s1329_s3 + $0x68] sm:$0xff] (!%p191_p2)  ;;  %v691_v36 = vld [vmem:[%s1329_s3 + $0x70] sm:$0xff] (!%p191_p2)  ;;  %v1248_v37 = vld [vmem:[%s1328_s2] ss:$0 sm:$0xff] (!%p191_p2) }
   0xe   : > { %1058 = vmatprep.subr.msk.bf16.mxu0 (!%p191_p2), %vm416_vm0, %v1074_v4  ;;  %1059 = vmatprep.subr.msk.bf16.mxu1 (!%p191_p2), %vm416_vm0, %v1074_v4 }
   0xf   : > { %s1333_s25 = smov (!%p218_p3, %s952_s25), 63  ;;  %s1335_s21 = smov (!%p223_p4, %s1148_s21), 1 }
  0x10   : > { %s953_s30 = sshll.u32 %s1333_s25, 2  ;;  %700 = vperm.xlu1 %1070, %v678_v6   ;;  %s954_s17 = sshll.u32 %s1335_s21, 1 }
  0x11   : > { %s1169_s8 = scalar_lea.vmem %s1326_s0, %s953_s30  ;;  %1019 = vmatpush3.bf16.msra.mxu0 %v418_v7  ;;  %1057 = vmatpush3.bf16.msra.mxu1 %v418_v7  ;;  %s226_s22 = scalar_lea.vmem %s1331_s5, %s954_s17 }
  0x12   : > { %v1075_v8 = vld [vmem:[%s1169_s8] sm:$0xff]   ;;  %v1077_v10 = vld [vmem:[%s1169_s8 + $0x8] sm:$0xff]   ;;  %v1079_v13 = vld [vmem:[%s1169_s8 + $0x10] sm:$0xff]  }
  0x13   : > { %v1076_v9 = vld [vmem:[%s1169_s8 + $0x40] sm:$0xff]   ;;  %1020 = vmatprep.mubr.msk.bf16.mxu0 %vm367_vm1, %v1075_v8  ;;  %v1078_v12 = vld [vmem:[%s1169_s8 + $0x48] sm:$0xff]   ;;  %v1081_v14 = vld [vmem:[%s1169_s8 + $0x50] sm:$0xff]  }
  0x14   : > { %1036 = vmatprep.mubr.msk.bf16.mxu1 %vm367_vm1, %v1076_v9  ;;  %1021 = vmatmul.mubr.msk.bf16.vlgmr.msra.gmra.mrb[0].mxu0 %vm367_vm1, %v1077_v10  ;;  %v1080_v16 = vld [vmem:[%s1169_s8 + $0x18] sm:$0xff]   ;;  %v1083_v18 = vld [vmem:[%s1169_s8 + $0x20] sm:$0xff]   ;;  %v1084_v22 = vld [vmem:[%s1169_s8 + $0x28] sm:$0xff]  }
  0x15   : > { %1037 = vmatmul.mubr.msk.bf16.vlgmr.msra.gmra.mrb[0].mxu1 %vm367_vm1, %v1078_v12  ;;  %1024 = vmatprep.mubr.msk.bf16.mxu0 %vm367_vm1, %v1079_v13  ;;  %v1082_v17 = vld [vmem:[%s1169_s8 + $0x58] sm:$0xff]   ;;  %v1085_v19 = vld [vmem:[%s1169_s8 + $0x60] sm:$0xff]   ;;  %v1086_v23 = vld [vmem:[%s1169_s8 + $0x68] sm:$0xff]  }
  0x16   : > { %705 = vperm.xlu1 %1070, %v679_v11   ;;  %1040 = vmatprep.mubr.msk.bf16.mxu1 %vm367_vm1, %v1081_v14  ;;  %v1087_v24 = vld [vmem:[%s1169_s8 + $0x30] sm:$0xff]   ;;  %v1088_v28 = vld [vmem:[%s1169_s8 + $0x38] sm:$0xff]  }
  0x17   : > { %v1089_v25 = vld [vmem:[%s1169_s8 + $0x70] sm:$0xff]   ;;  %v1090_v29 = vld [vmem:[%s1169_s8 + $0x78] sm:$0xff]  }
  0x1a   : > { %710 = vperm.xlu1 %1070, %v680_v15  }
  0x1c   : > { %1025 = vmatmul.mubr.msk.bf16.gmra.mrb[4].mxu0 %vm367_vm1, %v1080_v16 }
  0x1d   : > { %1041 = vmatmul.mubr.msk.bf16.gmra.mrb[4].mxu1 %vm367_vm1, %v1082_v17  ;;  %1028 = vmatprep.mubr.msk.bf16.mxu0 %vm367_vm1, %v1083_v18 }
  0x1e   : > { %1044 = vmatprep.mubr.msk.bf16.mxu1 %vm367_vm1, %v1085_v19  ;;  %715 = vperm.xlu1 %1070, %v681_v20  }
  0x22   : > { %720 = vperm.xlu1 %1070, %v682_v21  }
  0x24   : > { %1029 = vmatmul.mubr.msk.bf16.gmra.mrb[8].mxu0 %vm367_vm1, %v1084_v22 }
  0x25   : > { %1045 = vmatmul.mubr.msk.bf16.gmra.mrb[8].mxu1 %vm367_vm1, %v1086_v23  ;;  %1032 = vmatprep.mubr.msk.bf16.mxu0 %vm367_vm1, %v1087_v24 }
  0x26   : > { %1048 = vmatprep.mubr.msk.bf16.mxu1 %vm367_vm1, %v1089_v25  ;;  %725 = vperm.xlu1 %1070, %v683_v26  }
  0x2a   : > { %730 = vperm.xlu1 %1070, %v684_v27  }
  0x2c   : > { %1033 = vmatmul.mubr.msk.bf16.gmra.mrb[12].mxu0 %vm367_vm1, %v1088_v28 }
  0x2d   : > { %1049 = vmatmul.mubr.msk.bf16.gmra.mrb[12].mxu1 %vm367_vm1, %v1090_v29 }
  0x2e   : > { %735 = vperm.xlu1 %1070, %v685_v30  }
  0x32   : > { %740 = vperm.xlu1 %1070, %v686_v31  }
  0x36   : > { %745 = vperm.xlu1 %1070, %v687_v32  }
  0x3a   : > { %750 = vperm.xlu1 %1070, %v688_v33  }
  0x3e   : > { %755 = vperm.xlu1 %1070, %v689_v34  }
  0x42   : > { %760 = vperm.xlu1 %1070, %v690_v35  }
  0x46   : > { %765 = vperm.xlu1 %1070, %v691_v36  }
  0xe7   : > { %v1022_v38 = vpop.f32.mrb[0].mxu0 }
  0xe8   : > { %v1038_v39 = vpop.f32.mrb[0].mxu1  ;;  %v454_v40 = vpop.f32.mrb[1].mxu0  ;;  %v463_v54 = vadd.f32 %v1022_v38, %v1248_v37 }
  0xe9   : > { %v518_v41 = vpop.f32.mrb[1].mxu1  ;;  %v1023_v43 = vpop.f32.mrb[2].mxu0  ;;  %v455_v45 = vadd.f32 %v1248_v37, %v454_v40  ;;  %v527_v52 = vadd.f32 %v1038_v39, %v1248_v37 }
  0xea   : > { %v519_v42 = vadd.f32 %v1248_v37, %v518_v41  ;;  %v1039_v44 = vpop.f32.mrb[2].mxu1  ;;  %v457_v46 = vpop.f32.mrb[3].mxu0  ;;  %v583_v2 = vmax.f32 %v463_v54, 0.0  ;;  %v466_v3 = vadd.f32 %v1023_v43, %v1248_v37 }
  0xeb   : > { %v521_v47 = vpop.f32.mrb[3].mxu1  ;;  %v458_v49 = vadd.f32 %v1248_v37, %v457_v46  ;;  %v581_v51 = vmax.f32 %v455_v45, 0.0  ;;  %v599_v60 = vmax.f32 %v527_v52, 0.0  ;;  %v530_v61 = vadd.f32 %v1039_v44, %v1248_v37  ;;  %v1274_v54 = vpop.permute.xlu1 %695 }
  0xec   : > { %v597_v48 = vmax.f32 %v519_v42, 0.0  ;;  %v522_v50 = vadd.f32 %v1248_v37, %v521_v47  ;;  %v584_v8 = vmax.f32 %v466_v3, 0.0 }
  0xed   : > { %613 = vxpose.xlu0.b32.start [1/16] %v581_v51, 128  ;;  %v582_v55 = vmax.f32 %v458_v49, 0.0  ;;  %v600_v4 = vmax.f32 %v530_v61, 0.0 }
  0xee   : > { %v598_v53 = vmax.f32 %v522_v50, 0.0  ;;  %645 = vxpose.xlu1.b32.start [1/16] %v597_v48, 128 }
  0xef   : > { %v1026_v56 = vpop.f32.mrb[4].mxu0 }
  0xf0   : > { %v1042_v57 = vpop.f32.mrb[4].mxu1  ;;  %v470_v58 = vpop.f32.mrb[5].mxu0  ;;  %v479_v23 = vadd.f32 %v1026_v56, %v1248_v37 }
  0xf1   : > { %v534_v59 = vpop.f32.mrb[5].mxu1  ;;  %614 = vxpose.xlu0.b32.cont [2/16] %v582_v55, 128  ;;  %v1027_v62 = vpop.f32.mrb[6].mxu0  ;;  %v471_v6 = vadd.f32 %v1248_v37, %v470_v58  ;;  %v543_v21 = vadd.f32 %v1042_v57, %v1248_v37 }
  0xf2   : > { %646 = vxpose.xlu1.b32.cont [2/16] %v598_v53, 128  ;;  %v1043_v63 = vpop.f32.mrb[6].mxu1  ;;  %v473_v0 = vpop.f32.mrb[7].mxu0  ;;  %v535_v7 = vadd.f32 %v1248_v37, %v534_v59  ;;  %v587_v35 = vmax.f32 %v479_v23, 0.0  ;;  %v482_v36 = vadd.f32 %v1027_v62, %v1248_v37 }
  0xf3   : > { %v537_v1 = vpop.f32.mrb[7].mxu1  ;;  %v585_v13 = vmax.f32 %v471_v6, 0.0  ;;  %v474_v20 = vadd.f32 %v1248_v37, %v473_v0  ;;  %v603_v29 = vmax.f32 %v543_v21, 0.0  ;;  %v546_v30 = vadd.f32 %v1043_v63, %v1248_v37  ;;  %v701_v62 = vpop.permute.xlu1 %700 }
  0xf4   : > { %v601_v14 = vmax.f32 %v535_v7, 0.0  ;;  %v538_v15 = vadd.f32 %v1248_v37, %v537_v1  ;;  %v588_v41 = vmax.f32 %v482_v36, 0.0 }
  0xf5   : > { %615 = vxpose.xlu0.b32.cont [3/16] %v583_v2, 128  ;;  %v586_v24 = vmax.f32 %v474_v20, 0.0  ;;  %v604_v38 = vmax.f32 %v546_v30, 0.0  ;;  %v847_v20 = vld [vmem:[#allocation2] sm:$0x1] }
  0xf6   : > { %647 = vxpose.xlu1.b32.cont [3/16] %v599_v60, 128  ;;  %v602_v22 = vmax.f32 %v538_v15, 0.0 }
  0xf7   : > { %v1030_v9 = vpop.f32.mrb[8].mxu0 }
  0xf8   : > { %v1046_v10 = vpop.f32.mrb[8].mxu1  ;;  %v486_v11 = vpop.f32.mrb[9].mxu0  ;;  %v495_v48 = vadd.f32 %v1030_v9, %v1248_v37 }
  0xf9   : > { %v550_v12 = vpop.f32.mrb[9].mxu1  ;;  %616 = vxpose.xlu0.b32.cont [4/16] %v584_v8, 128  ;;  %v1031_v16 = vpop.f32.mrb[10].mxu0  ;;  %v487_v39 = vadd.f32 %v1248_v37, %v486_v11  ;;  %v559_v46 = vadd.f32 %v1046_v10, %v1248_v37 }
  0xfa   : > { %648 = vxpose.xlu1.b32.cont [4/16] %v600_v4, 128  ;;  %v1047_v17 = vpop.f32.mrb[10].mxu1  ;;  %v489_v18 = vpop.f32.mrb[11].mxu0  ;;  %v551_v40 = vadd.f32 %v1248_v37, %v550_v12  ;;  %v591_v52 = vmax.f32 %v495_v48, 0.0  ;;  %v498_v53 = vadd.f32 %v1031_v16, %v1248_v37 }
  0xfb   : > { %v553_v19 = vpop.f32.mrb[11].mxu1  ;;  %v589_v42 = vmax.f32 %v487_v39, 0.0  ;;  %v490_v45 = vadd.f32 %v1248_v37, %v489_v18  ;;  %v607_v50 = vmax.f32 %v559_v46, 0.0  ;;  %v562_v51 = vadd.f32 %v1047_v17, %v1248_v37  ;;  %v706_v4 = vpop.permute.xlu1 %705 }
  0xfc   : > { %v605_v43 = vmax.f32 %v551_v40, 0.0  ;;  %v554_v44 = vadd.f32 %v1248_v37, %v553_v19  ;;  %v592_v58 = vmax.f32 %v498_v53, 0.0  ;;  %v692_v19 = vld [vmem:[%s1329_s3 + $0x78] sm:$0xff] }
  0xfd   : > { %617 = vxpose.xlu0.b32.cont [5/16] %v585_v13, 128  ;;  %v590_v49 = vmax.f32 %v490_v45, 0.0  ;;  %v608_v55 = vmax.f32 %v562_v51, 0.0 }
  0xfe   : > { %649 = vxpose.xlu1.b32.cont [5/16] %v601_v14, 128  ;;  %v606_v47 = vmax.f32 %v554_v44, 0.0 }
  0xff   : > { %v1034_v25 = vpop.f32.mrb[12].mxu0  ;;  %v711_v11 = vpop.permute.xlu1 %710 }
 0x100   : > { %v1050_v26 = vpop.f32.mrb[12].mxu1  ;;  %v502_v27 = vpop.f32.mrb[13].mxu0  ;;  %v511_v2 = vadd.f32 %v1034_v25, %v1248_v37 }
 0x101   : > { %v566_v28 = vpop.f32.mrb[13].mxu1  ;;  %618 = vxpose.xlu0.b32.cont [6/16] %v586_v24, 128  ;;  %v1035_v31 = vpop.f32.mrb[14].mxu0  ;;  %v503_v56 = vadd.f32 %v1248_v37, %v502_v27  ;;  %v575_v0 = vadd.f32 %v1050_v26, %v1248_v37 }
 0x102   : > { %650 = vxpose.xlu1.b32.cont [6/16] %v602_v22, 128  ;;  %v1051_v32 = vpop.f32.mrb[14].mxu1  ;;  %v505_v33 = vpop.f32.mrb[15].mxu0  ;;  %v567_v57 = vadd.f32 %v1248_v37, %v566_v28  ;;  %v595_v8 = vmax.f32 %v511_v2, 0.0  ;;  %v514_v9 = vadd.f32 %v1035_v31, %v1248_v37 }
 0x103   : > { %v569_v34 = vpop.f32.mrb[15].mxu1  ;;  %v593_v59 = vmax.f32 %v503_v56, 0.0  ;;  %v506_v63 = vadd.f32 %v1248_v37, %v505_v33  ;;  %v611_v6 = vmax.f32 %v575_v0, 0.0  ;;  %v578_v7 = vadd.f32 %v1051_v32, %v1248_v37  ;;  %v716_v13 = vpop.permute.xlu1 %715 }
 0x104   : > { %v609_v60 = vmax.f32 %v567_v57, 0.0  ;;  %v570_v61 = vadd.f32 %v1248_v37, %v569_v34  ;;  %v596_v12 = vmax.f32 %v514_v9, 0.0 }
 0x105   : > { %619 = vxpose.xlu0.b32.cont [7/16] %v587_v35, 128  ;;  %v594_v3 = vmax.f32 %v506_v63, 0.0  ;;  %v612_v10 = vmax.f32 %v578_v7, 0.0 }
 0x106   : > { %651 = vxpose.xlu1.b32.cont [7/16] %v603_v29, 128  ;;  %v610_v1 = vmax.f32 %v570_v61, 0.0 }
 0x107   : > { %v721_v14 = vpop.permute.xlu1 %720 }
 0x109   : > { %620 = vxpose.xlu0.b32.cont [8/16] %v588_v41, 128 }
 0x10a   : > { %652 = vxpose.xlu1.b32.cont [8/16] %v604_v38, 128 }
 0x10b   : > { %v726_v15 = vpop.permute.xlu1 %725 }
 0x10d   : > { %621 = vxpose.xlu0.b32.cont [9/16] %v589_v42, 128 }
 0x10e   : > { %653 = vxpose.xlu1.b32.cont [9/16] %v605_v43, 128 }
 0x10f   : > { %v731_v16 = vpop.permute.xlu1 %730 }
 0x111   : > { %622 = vxpose.xlu0.b32.cont [10/16] %v590_v49, 128 }
 0x112   : > { %654 = vxpose.xlu1.b32.cont [10/16] %v606_v47, 128 }
 0x113   : > { %v1284_v17 = vpop.permute.xlu1 %735 }
 0x115   : > { %623 = vxpose.xlu0.b32.cont [11/16] %v591_v52, 128 }
 0x116   : > { %655 = vxpose.xlu1.b32.cont [11/16] %v607_v50, 128 }
 0x117   : > { %v1286_v18 = vpop.permute.xlu1 %740 }
 0x119   : > { %624 = vxpose.xlu0.b32.cont [12/16] %v592_v58, 128 }
 0x11a   : > { %656 = vxpose.xlu1.b32.cont [12/16] %v608_v55, 128 }
 0x11b   : > { %v1291_v37 = vpop.permute.xlu1 %745 }
 0x11d   : > { %625 = vxpose.xlu0.b32.cont [13/16] %v593_v59, 128 }
 0x11e   : > { %657 = vxpose.xlu1.b32.cont [13/16] %v609_v60, 128 }
 0x11f   : > { %v1294_v21 = vpop.permute.xlu1 %750 }
 0x121   : > { %626 = vxpose.xlu0.b32.cont [14/16] %v594_v3, 128 }
 0x122   : > { %658 = vxpose.xlu1.b32.cont [14/16] %v610_v1, 128 }
 0x123   : > { %v1296_v22 = vpop.permute.xlu1 %755 }
 0x125   : > { %627 = vxpose.xlu0.b32.cont [15/16] %v595_v8, 128 }
 0x126   : > { %659 = vxpose.xlu1.b32.cont [15/16] %v611_v6, 128 }
 0x127   : > { %v1298_v23 = vpop.permute.xlu1 %760 }
 0x129   : > { %628 = vxpose.xlu0.b32.end [16/16] %v596_v12, 128 }
 0x12a   : > { %660 = vxpose.xlu1.b32.end [16/16] %v612_v10, 128 }
 0x12b   : > { %v1300_v24 = vpop.permute.xlu1 %765 }
 0x152   : > { %1071 = vset.pattern.permute.xlu0 %v1107_v5 }
 0x153   : > { %770 = vperm.xlu0 %1071, %v692_v19  }
 0x157   : > { %850 = vperm.xlu0 %1071, %v847_v20  }
 0x16d   : > { %v629_v26 = vpop.trf.xlu0 }
 0x16e   : > { %v661_v25 = vpop.trf.xlu1  ;;  %v773_v44 = vmul.f32 %v1274_v54, %v629_v26 }
 0x16f   : > { %v774_v43 = vmul.f32 %v1274_v54, %v661_v25 }
 0x171   : > { %v630_v28 = vpop.trf.xlu0 }
 0x172   : > { %v662_v27 = vpop.trf.xlu1  ;;  %v775_v40 = vmul.f32 %v701_v62, %v630_v28 }
 0x173   : > { %v776_v39 = vmul.f32 %v701_v62, %v662_v27 }
 0x174   : > { %v805_v48 = vadd.f32 %v775_v40, %v773_v44 }
 0x175   : > { %v631_v30 = vpop.trf.xlu0  ;;  %v826_v47 = vadd.f32 %v776_v39, %v774_v43 }
 0x176   : > { %v663_v29 = vpop.trf.xlu1  ;;  %v777_v46 = vmul.f32 %v706_v4, %v631_v30 }
 0x177   : > { %v778_v45 = vmul.f32 %v706_v4, %v663_v29 }
 0x178   : > { %v806_v55 = vadd.f32 %v805_v48, %v777_v46 }
 0x179   : > { %v632_v32 = vpop.trf.xlu0  ;;  %v827_v53 = vadd.f32 %v826_v47, %v778_v45 }
 0x17a   : > { %v664_v31 = vpop.trf.xlu1  ;;  %v779_v50 = vmul.f32 %v711_v11, %v632_v32 }
 0x17b   : > { %v780_v49 = vmul.f32 %v711_v11, %v664_v31 }
 0x17c   : > { %v807_v59 = vadd.f32 %v806_v55, %v779_v50 }
 0x17d   : > { %v633_v33 = vpop.trf.xlu0  ;;  %v828_v58 = vadd.f32 %v827_v53, %v780_v49 }
 0x17e   : > { %v665_v5 = vpop.trf.xlu1  ;;  %v781_v57 = vmul.f32 %v716_v13, %v633_v33 }
 0x17f   : > { %v782_v56 = vmul.f32 %v716_v13, %v665_v5 }
 0x180   : > { %v808_v54 = vadd.f32 %v807_v59, %v781_v57  ;;  %v853_v59 = vlaneseq }
 0x181   : > { %v634_v35 = vpop.trf.xlu0  ;;  %v829_v0 = vadd.f32 %v828_v58, %v782_v56 }
 0x182   : > { %v666_v34 = vpop.trf.xlu1  ;;  %v783_v61 = vmul.f32 %v721_v14, %v634_v35  ;;  %vm891_vm2 = vcmp.lt.s32.totalorder %v853_v59, 256 }
 0x183   : > { %v784_v60 = vmul.f32 %v721_v14, %v666_v34 }
 0x184   : > { %v809_v4 = vadd.f32 %v808_v54, %v783_v61 }
 0x185   : > { %v635_v38 = vpop.trf.xlu0  ;;  %v830_v3 = vadd.f32 %v829_v0, %v784_v60 }
 0x186   : > { %v667_v36 = vpop.trf.xlu1  ;;  %v785_v2 = vmul.f32 %v726_v15, %v635_v38 }
 0x187   : > { %v786_v1 = vmul.f32 %v726_v15, %v667_v36 }
 0x188   : > { %v810_v11 = vadd.f32 %v809_v4, %v785_v2 }
 0x189   : > { %v636_v42 = vpop.trf.xlu0  ;;  %v831_v10 = vadd.f32 %v830_v3, %v786_v1 }
 0x18a   : > { %v668_v41 = vpop.trf.xlu1  ;;  %v787_v7 = vmul.f32 %v731_v16, %v636_v42 }
 0x18b   : > { %v788_v6 = vmul.f32 %v731_v16, %v668_v41 }
 0x18c   : > { %v811_v14 = vadd.f32 %v810_v11, %v787_v7 }
 0x18d   : > { %v637_v52 = vpop.trf.xlu0  ;;  %v832_v19 = vadd.f32 %v831_v10, %v788_v6 }
 0x18e   : > { %v669_v51 = vpop.trf.xlu1  ;;  %v789_v13 = vmul.f32 %v1284_v17, %v637_v52 }
 0x18f   : > { %v790_v12 = vmul.f32 %v1284_v17, %v669_v51 }
 0x190   : > { %v812_v28 = vadd.f32 %v811_v14, %v789_v13 }
 0x191   : > { %v638_v63 = vpop.trf.xlu0  ;;  %v833_v27 = vadd.f32 %v832_v19, %v790_v12 }
 0x192   : > { %v670_v62 = vpop.trf.xlu1  ;;  %v791_v25 = vmul.f32 %v1286_v18, %v638_v63  ;;  %v854_v63 = vshrl.u32 %v853_v59, 7 }
 0x193   : > { %v792_v20 = vmul.f32 %v1286_v18, %v670_v62 }
 0x194   : > { %v813_v31 = vadd.f32 %v812_v28, %v791_v25  ;;  %v855_v3 = vsub.s32 0, %v854_v63 }
 0x195   : > { %v639_v9 = vpop.trf.xlu0  ;;  %v834_v30 = vadd.f32 %v833_v27, %v792_v20 }
 0x196   : > { %v671_v8 = vpop.trf.xlu1  ;;  %v793_v29 = vmul.f32 %v1291_v37, %v639_v9 }
 0x197   : > { %v794_v16 = vmul.f32 %v1291_v37, %v671_v8 }
 0x198   : > { %v814_v35 = vadd.f32 %v813_v31, %v793_v29 }
 0x199   : > { %v640_v15 = vpop.trf.xlu0  ;;  %v835_v34 = vadd.f32 %v834_v30, %v794_v16 }
 0x19a   : > { %v672_v26 = vpop.trf.xlu1  ;;  %v795_v17 = vmul.f32 %v1294_v21, %v640_v15 }
 0x19b   : > { %v796_v32 = vmul.f32 %v1294_v21, %v672_v26  ;;  %v1108_v26 = vmov 1966171168  }
 0x19c   : > { %v815_v39 = vadd.f32 %v814_v35, %v795_v17  ;;  %v875_v15 = vunpack.c.l.s4 %v1108_v26 }
 0x19d   : > { %v641_v33 = vpop.trf.xlu0  ;;  %v836_v38 = vadd.f32 %v835_v34, %v796_v32 }
 0x19e   : > { %v673_v5 = vpop.trf.xlu1  ;;  %v797_v36 = vmul.f32 %v1296_v22, %v641_v33  ;;  %v876_v27 = vunpack.c.0.s8 %v875_v15 }
 0x19f   : > { %v798_v18 = vmul.f32 %v1296_v22, %v673_v5 }
 0x1a0   : > { %v816_v37 = vadd.f32 %v815_v39, %v797_v36  ;;  %v879_v16 = vsub.s32 %v876_v27, %v854_v63 }
 0x1a1   : > { %v642_v41 = vpop.trf.xlu0  ;;  %v837_v42 = vadd.f32 %v836_v38, %v798_v18 }
 0x1a2   : > { %v674_v40 = vpop.trf.xlu1  ;;  %v799_v44 = vmul.f32 %v1298_v23, %v642_v41 }
 0x1a3   : > { %v800_v43 = vmul.f32 %v1298_v23, %v674_v40 }
 0x1a4   : > { %v817_v21 = vadd.f32 %v816_v37, %v799_v44 }
 0x1a5   : > { %v838_v45 = vadd.f32 %v837_v42, %v800_v43  ;;  %v643_v46 = vpop.trf.xlu0 }
 0x1a6   : > { %v675_v47 = vpop.trf.xlu1  ;;  %v801_v50 = vmul.f32 %v1300_v24, %v643_v46 }
 0x1a7   : > { %v802_v49 = vmul.f32 %v1300_v24, %v675_v47 }
 0x1a8   : > { %v818_v53 = vadd.f32 %v817_v21, %v801_v50 }
 0x1a9   : > { %v644_v48 = vpop.trf.xlu0  ;;  %v839_v52 = vadd.f32 %v838_v45, %v802_v49 }
 0x1aa   : > { %v676_v22 = vpop.trf.xlu1 }
 0x1d2   : > { %v771_v51 = vpop.permute.xlu0 %770 }
 0x1d3   : > { %v803_v55 = vmul.f32 %v771_v51, %v644_v48  ;;  %v804_v56 = vmul.f32 %v771_v51, %v676_v22 }
 0x1d5   : > { %v819_v57 = vadd.f32 %v818_v53, %v803_v55  ;;  %v840_v58 = vadd.f32 %v839_v52, %v804_v56 }
 0x1d6   : > { %v851_v24 = vpop.permute.xlu0 %850 }
 0x1d7   : > { %v820_v60 = vrot.slane %v819_v57, 4  ;;  %v841_v23 = vrot.slane %v840_v58, 4  ;;  %v856_v9 = vrot.slane %v851_v24, %v855_v3 }
 0x1d9   : > { %v821_v61 = vadd.f32 %v820_v60, %v819_v57  ;;  %v842_v62 = vadd.f32 %v841_v23, %v840_v58 }
 0x1db   : > { %v822_v0 = vrot.slane %v821_v61, 2  ;;  %v843_v54 = vrot.slane %v842_v62, 2 }
 0x1dd   : > { %v823_v1 = vadd.f32 %v822_v0, %v821_v61  ;;  %v844_v2 = vadd.f32 %v843_v54, %v842_v62 }
 0x1df   : > { %v824_v4 = vrot.slane %v823_v1, 1  ;;  %v845_v6 = vrot.slane %v844_v2, 1 }
 0x1e1   : > { %v825_v7 = vadd.f32 %v824_v4, %v823_v1  ;;  %v846_v8 = vadd.f32 %v845_v6, %v844_v2 }
 0x1e3   : > { %v857_v10 = vadd.f32 %v856_v9, %v825_v7  ;;  %v858_v11 = vadd.f32 %v856_v9, %v846_v8 }
 0x1e5   : > { %v991_v12 = vmul.f32 -1.442695, %v857_v10  ;;  %v992_v13 = vmul.f32 -1.442695, %v858_v11 }
 0x1e7   : > { %1091 = vpow2.f32 %v991_v12 }
 0x1e8   : > { %1093 = vpow2.f32 %v992_v13 }
 0x1f1   : > { %v1092_v19 = vpop.eup %1091 }
 0x1f2   : > { %v1094_v14 = vpop.eup %1093  ;;  %v865_v20 = vadd.f32 1.0, %v1092_v19 }
 0x1f3   : > { %v866_v25 = vadd.f32 1.0, %v1094_v14 }
 0x1f4   : > { %1095 = vrcp.f32 %v865_v20 }
 0x1f5   : > { %1097 = vrcp.f32 %v866_v25 }
 0x1fe   : > { %v1096_v28 = vpop.eup %1095 }
 0x1ff   : > { %v1098_v29 = vpop.eup %1097 }
 0x200   : > { %v873_v30 = vcombine.low %v1096_v28, %v1098_v29 }
 0x202   : > { %v880_v31 = vrot.slane %v873_v30, %v879_v16 }
 0x204   : > { %v887_v32 = vrot.slane %v880_v31, %v879_v16 }
 0x206   : > { %893 = vst.msk [vmem:[%s226_s22] sm:$0x3] %vm891_vm2, %v887_v32 }
 0x207 PF: > { %s17_s20 = sadd.s32 1, %s1105_s20  }
 0x208   : > { %p14_p5 = scmp.ge.s32.totalorder %s17_s20, 4  }
 0x20a   :  { %16 = sbr.rel (!%p14_p5) target bundleno = 3 (0x3), region = 70 }

</bundles_post_ra>
